<compile_context>
chip_gen: v7x
topology: tpu7x:2x2x1
jax: 0.10.0
libtpu: 0.0.40
codegen_flags: <defaults>
</compile_context>

<pallas_src>
import jax
import jax.numpy as jnp
from jax import lax
from jax.experimental import pallas as pl
from jax.experimental.pallas import tpu as pltpu


_NEG_BIG = -1e30
_EPS = 1e-9


def _make_kernel(n_valid, n_pad, tm, tn, inv_temp, use_mask2d, use_sel2d):
    """Kernel factory. Tiles are (tn, tm) = (contrast, anchor) oriented."""
    n_tail_pad = n_pad - n_valid        # padded columns (all in the last j tile)

    def kernel(*refs):
        it = iter(refs)
        a_ref = next(it)      # (tm, d)  anchor features
        c_ref = next(it)      # (tn, d)  contrast features
        rlab_ref = next(it)   # (1, tm)  anchor labels (int32)
        clab_ref = next(it)   # (tn, 1)  contrast labels (int32)
        rw_ref = next(it)     # (1, tm)  anchor weights (max_probs or 1)
        cw_ref = next(it)     # (tn, 1)  contrast weights
        m2_ref = next(it) if use_mask2d else None   # (tn, tm) explicit mask factor
        s2_ref = next(it) if use_sel2d else None    # (tn, tm) select matrix
        out_ref = next(it)    # (1, tm)  per-anchor loss
        m_sc = next(it)       # (1, tm)  running row max
        l_sc = next(it)       # (1, tm)  running sum of exp(logits - m)
        swl_sc = next(it)     # (1, tm)  sum of (mask*sel) * raw_logits
        sm_sc = next(it)      # (1, tm)  sum of mask
        sw_sc = next(it) if use_sel2d else None     # (1, tm) sum of mask*sel

        i = pl.program_id(0)  # anchor-tile index (parallel)
        j = pl.program_id(1)  # contrast-tile index (reduction axis, last)

        @pl.when(j == 0)
        def _init():
            m_sc[...] = jnp.full_like(m_sc, _NEG_BIG)
            l_sc[...] = jnp.zeros_like(l_sc)
            swl_sc[...] = jnp.zeros_like(swl_sc)
            sm_sc[...] = jnp.zeros_like(sm_sc)
            if use_sel2d:
                sw_sc[...] = jnp.zeros_like(sw_sc)

        # ---------------- hot path: no iota / diagonal / padding selects -----
        # Fold 1/temperature into the small (tm, d) anchor tile (d << tn) so
        # the (tn, tm) logits tile never needs a full-tile scale.
        a = a_ref[...] * inv_temp
        logits = lax.dot_general(
            c_ref[...], a, dimension_numbers=(((1,), (1,)), ((), ())),
            preferred_element_type=jnp.float32)             # (tn, tm)

        # Online log-sum-exp.  The running max may include the self column (as
        # in the reference) and the zero logits of padded columns (harmless:
        # LSE is shift-invariant and padded columns are removed exactly below).
        m_prev = m_sc[...]
        m_new = jnp.maximum(m_prev, jnp.max(logits, axis=0, keepdims=True))
        l_base = jnp.exp(m_prev - m_new) * l_sc[...]
        p = jnp.exp(logits - m_new)                         # includes self/pad cols

        # Positive-pair mask rebuilt from O(N) vectors (+ optional dense factor).
        lab_eq = clab_ref[...] == rlab_ref[...]             # (tn,1)==(1,tm) -> (tn,tm)
        w = cw_ref[...] * rw_ref[...]                       # max_probs outer product
        if use_mask2d:
            w = w * m2_ref[...]
        mask = jnp.where(lab_eq, w, 0.0)                    # still includes diagonal
        wsel = mask * s2_ref[...] if use_sel2d else mask
        wl = wsel * logits

        m_sc[...] = m_new
        l_sc[...] = l_base + jnp.sum(p, axis=0, keepdims=True)
        sm_sc[...] += jnp.sum(mask, axis=0, keepdims=True)
        if use_sel2d:
            sw_sc[...] += jnp.sum(wsel, axis=0, keepdims=True)
        swl_sc[...] += jnp.sum(wl, axis=0, keepdims=True)

        # -------- self-pair fix-up: only tiles that straddle the diagonal ----
        row_start = i * tm
        col_start = j * tn
        has_diag = jnp.logical_and(row_start < col_start + tn,
                                   col_start < row_start + tm)

        @pl.when(has_diag)
        def _fix_diag():
            row_g = row_start + lax.broadcasted_iota(jnp.int32, (tn, tm), 1)
            col_g = col_start + lax.broadcasted_iota(jnp.int32, (tn, tm), 0)
            is_diag = row_g == col_g
            # Recompute the denominator contribution without the self column
            # (avoids cancellation against the dominant exp(0) self term), and
            # subtract the self terms from the positive sums (exact: off-diag
            # entries are either untouched or exactly 0.0).
            l_sc[...] = l_base + jnp.sum(jnp.where(is_diag, 0.0, p),
                                         axis=0, keepdims=True)
            sm_sc[...] -= jnp.sum(jnp.where(is_diag, mask, 0.0),
                                  axis=0, keepdims=True)
            if use_sel2d:
                sw_sc[...] -= jnp.sum(jnp.where(is_diag, wsel, 0.0),
                                      axis=0, keepdims=True)
            swl_sc[...] -= jnp.sum(jnp.where(is_diag, wl, 0.0),
                                   axis=0, keepdims=True)

        # --------------------------------- finalize ---------------------------
        @pl.when(j == pl.num_programs(1) - 1)
        def _finalize():
            l = l_sc[...]
            if n_tail_pad > 0:
                # Padded contrast rows are all-zero, so each padded column
                # contributed exactly exp(0 - m) to l; remove them here instead
                # of masking the hot path.  (Their mask weights are exactly 0,
                # so the positive sums need no correction.)
                l = l - jnp.float32(n_tail_pad) * jnp.exp(-m_sc[...])
            log_denom = m_sc[...] + jnp.log(l + _EPS)
            sum_mask = sm_sc[...]
            sw = sw_sc[...] if use_sel2d else sum_mask
            safe = jnp.where(sum_mask == 0.0, 1.0, sum_mask)
            # sum_j w*log_prob = sum_j w*raw_logit - log_denom * sum_j w
            mean_lpp = (swl_sc[...] - log_denom * sw) * pl.reciprocal(
                safe, approx=False)
            out_ref[...] = -mean_lpp                        # lane-dense (1, tm) store

    return kernel


def _round_up(x, m):
    return (x + m - 1) // m * m


def _vmem_capacity_bytes():
    try:
        cap = int(pltpu.get_tpu_info().vmem_capacity_bytes)
        if cap > 0:
            return cap
    except Exception:
        pass
    return 64 * 1024 * 1024       # conservative default (v7x per-TensorCore)


def _pick_tiles(na, n, d, itemsize, n_dense):
    """Choose (tm, na_pad, tn, n_pad, vmem_limit).

    tm: anchor tile (lane axis of every tile and of the output).
    tn: contrast tile (sublane / reduction axis, last grid dim).
    """
    vmem_cap = _vmem_capacity_bytes()
    big_vmem = vmem_cap >= (100 << 20)          # v5e / v6e: 128 MiB per core
    budget_cap = (40 << 20) if big_vmem else (20 << 20)
    tn_cap = 1024 if big_vmem else 512
    # On small-VMEM / 2-TensorCore chips (v7x) prefer tm=128 so the parallel
    # anchor axis load-balances; on v5e/v6e prefer the biggest tile.
    tm_cands = (512, 384, 256, 128) if big_vmem else (128, 256, 384, 512)

    if na <= 512:
        tm, na_pad = na, na                     # single anchor tile, no padding
    else:
        tm, na_pad = None, None
        for cand in tm_cands:                   # minimize anchor padding
            pad = _round_up(na, cand)
            if na_pad is None or pad < na_pad:
                tm, na_pad = cand, pad

    def budget(tn_):
        b = 2 * (tn_ + tm) * d * itemsize       # double-buffered feature tiles
        b += 8 * tn_ * tm * 4                   # (tn, tm) f32 intermediates
        b += n_dense * 2 * tn_ * tm * 4         # optional dense mask/select blocks
        return b

    while tn_cap > 128 and budget(tn_cap) > budget_cap:
        tn_cap //= 2

    if n <= tn_cap:
        tn, n_pad = n, n                        # single reduction step
    else:
        k = -(-n // tn_cap)                     # number of reduction steps
        tn = _round_up(-(-n // k), 8)           # minimize column padding
        n_pad = tn * k

    vmem_limit = int(max(32 << 20, min(2 * budget(tn) + (4 << 20), 56 << 20)))
    return tm, na_pad, tn, n_pad, vmem_limit


def _run_kernel(anchor, contrast, row_lab, col_lab, row_w, col_w,
                mask2d_t, sel2d_t, temperature):
    na, d = anchor.shape
    n, _ = contrast.shape
    use_mask2d = mask2d_t is not None
    use_sel2d = sel2d_t is not None
    tm, na_pad, tn, n_pad, vmem_limit = _pick_tiles(
        na, n, d, anchor.dtype.itemsize, int(use_mask2d) + int(use_sel2d))

    def pad_rows(x, rows):
        if x.shape[0] == rows:
            return x
        return jnp.pad(x, ((0, rows - x.shape[0]),) + ((0, 0),) * (x.ndim - 1))

    # NOTE: the padding corrections rely on jnp.pad's zero fill (padded
    # contrast rows -> zero logits, padded weights -> zero mask entries).
    anchor_p = pad_rows(anchor, na_pad)
    contrast_p = pad_rows(contrast, n_pad)
    row_lab_p = jnp.pad(row_lab.astype(jnp.int32), (0, na_pad - na)).reshape(1, na_pad)
    row_w_p = jnp.pad(row_w.astype(jnp.float32), (0, na_pad - na)).reshape(1, na_pad)
    col_lab_p = jnp.pad(col_lab.astype(jnp.int32), (0, n_pad - n)).reshape(n_pad, 1)
    col_w_p = jnp.pad(col_w.astype(jnp.float32), (0, n_pad - n)).reshape(n_pad, 1)

    in_specs = [
        pl.BlockSpec((tm, d), lambda i, j: (i, 0)),     # anchor rows
        pl.BlockSpec((tn, d), lambda i, j: (j, 0)),     # contrast rows
        pl.BlockSpec((1, tm), lambda i, j: (0, i)),     # anchor labels
        pl.BlockSpec((tn, 1), lambda i, j: (j, 0)),     # contrast labels
        pl.BlockSpec((1, tm), lambda i, j: (0, i)),     # anchor weights
        pl.BlockSpec((tn, 1), lambda i, j: (j, 0)),     # contrast weights
    ]
    inputs = [anchor_p, contrast_p, row_lab_p, col_lab_p, row_w_p, col_w_p]
    if use_mask2d:
        in_specs.append(pl.BlockSpec((tn, tm), lambda i, j: (j, i)))
        inputs.append(jnp.pad(mask2d_t.astype(jnp.float32),
                              ((0, n_pad - n), (0, na_pad - na))))
    if use_sel2d:
        in_specs.append(pl.BlockSpec((tn, tm), lambda i, j: (j, i)))
        inputs.append(jnp.pad(sel2d_t.astype(jnp.float32),
                              ((0, n_pad - n), (0, na_pad - na))))

    # TODO(synk): for bf16 features the 1/T scale is applied in bf16 before the
    # MXU (tiny extra rounding vs. the f32 reference); acceptable for a loss.
    kernel = _make_kernel(n, n_pad, tm, tn, float(1.0 / temperature),
                          use_mask2d, use_sel2d)

    scratch_shapes = [pltpu.VMEM((1, tm), jnp.float32)] * (5 if use_sel2d else 4)

    feat_bytes = anchor_p.dtype.itemsize
    cost = pl.CostEstimate(
        flops=2 * na_pad * n_pad * d,
        transcendentals=na_pad * n_pad,
        bytes_accessed=(na_pad * d + (na_pad // tm) * n_pad * d) * feat_bytes
        + (na_pad + n_pad) * 8 + na_pad * 4
        + n_pad * na_pad * 4 * (int(use_mask2d) + int(use_sel2d)),
    )

    out = pl.pallas_call(
        kernel,
        out_shape=jax.ShapeDtypeStruct((1, na_pad), jnp.float32),
        grid=(na_pad // tm, n_pad // tn),
        in_specs=in_specs,
        out_specs=pl.BlockSpec((1, tm), lambda i, j: (0, i)),
        scratch_shapes=scratch_shapes,
        compiler_params=pltpu.CompilerParams(
            dimension_semantics=("parallel", "arbitrary"),
            vmem_limit_bytes=vmem_limit,
        ),
        cost_estimate=cost,
    )(*inputs)
    return out[0, :na]


def debias_soft_con_loss(features, max_probs=None, labels=None, mask=None,
                         pos_mask=None, neg_mask=None, reduction='mean',
                         select_matrix=None, temperature=0.07,
                         contrast_mode='all', base_temperature=0.07):
    """Forward pass of DebiasSoftConLoss (pos_mask/neg_mask/base_temperature
    are unused by the reference forward and kept only for signature parity)."""
    b, v, d = features.shape

    # --- factor the pair mask into O(N) labels/weights (+ optional dense factor)
    dense_mask = None
    if mask is None and max_probs is None and labels is None:
        base_lab = jnp.arange(b, dtype=jnp.int32)            # identity mask
        base_w = jnp.ones((b,), jnp.float32)
    elif labels is None and max_probs is None:
        base_lab = jnp.zeros((b,), jnp.int32)                # all labels "equal"
        base_w = jnp.ones((b,), jnp.float32)
        dense_mask = jnp.asarray(mask, jnp.float32)
    else:
        if labels is None:
            raise ValueError('Num of labels does not match num of features')
        labels = jnp.asarray(labels).reshape(-1)
        if labels.shape[0] != b:
            raise ValueError('Num of labels does not match num of features')
        base_lab = labels.astype(jnp.int32)
        base_w = (jnp.asarray(max_probs).reshape(-1).astype(jnp.float32)
                  if max_probs is not None else jnp.ones((b,), jnp.float32))
        if mask is not None:
            dense_mask = jnp.asarray(mask, jnp.float32)

    contrast_count = v
    # torch.cat(torch.unbind(features, 1), 0): view-major ordering.
    contrast_feature = jnp.transpose(features, (1, 0, 2)).reshape(v * b, d)
    if contrast_mode == 'one':
        anchor_feature = features[:, 0]
        anchor_count = 1
    elif contrast_mode == 'all':
        anchor_feature = contrast_feature
        anchor_count = contrast_count
    else:
        raise ValueError('Unknown mode: {}'.format(contrast_mode))

    row_lab = jnp.tile(base_lab, anchor_count)
    col_lab = jnp.tile(base_lab, contrast_count)
    row_w = jnp.tile(base_w, anchor_count)
    col_w = jnp.tile(base_w, contrast_count)

    # Rare fallback: explicit per-pair mask / select_matrix are inherently
    # O(N^2) inputs; tile the *transposed* b x b factor so no (N, Na)
    # transpose is ever materialized.
    mask2d_t = None
    if dense_mask is not None:
        mask2d_t = jnp.tile(dense_mask.T, (contrast_count, anchor_count))
    sel2d_t = None
    if select_matrix is not None:
        sel2d_t = jnp.tile(jnp.asarray(select_matrix, jnp.float32).T,
                           (contrast_count, anchor_count))

    per_anchor = _run_kernel(anchor_feature, contrast_feature,
                             row_lab, col_lab, row_w, col_w,
                             mask2d_t, sel2d_t, temperature)      # (Na,)
    loss = per_anchor.reshape(anchor_count, b)
    if reduction == 'mean':
        loss = loss.mean()
    return loss


def _reference_loss(features, max_probs=None, labels=None, mask=None,
                    select_matrix=None, temperature=0.07, contrast_mode='all'):
    """Pure-JAX mirror of the PyTorch forward (HIGHEST-precision matmuls)."""
    b, v, d = features.shape
    if mask is None and max_probs is None and labels is None:
        mask = jnp.eye(b, dtype=jnp.float32)
    elif labels is None and max_probs is None:
        mask = jnp.asarray(mask, jnp.float32)
    else:
        labels = jnp.asarray(labels).reshape(-1, 1)
        label_mask = (labels == labels.T).astype(jnp.float32)
        if max_probs is not None:
            mp = jnp.asarray(max_probs).reshape(-1, 1).astype(jnp.float32)
            label_mask = label_mask * (mp @ mp.T)
            mask = label_mask * jnp.asarray(mask, jnp.float32) if mask is not None else label_mask
        elif mask is not None:
            mask = label_mask * jnp.asarray(mask, jnp.float32)
        else:
            mask = label_mask
    cf = jnp.transpose(features, (1, 0, 2)).reshape(v * b, d).astype(jnp.float32)
    if contrast_mode == 'one':
        af, ac = features[:, 0].astype(jnp.float32), 1
    else:
        af, ac = cf, v
    hi = jax.lax.Precision.HIGHEST
    logits = jnp.dot(af, cf.T, precision=hi) / temperature
    logits = logits - jnp.max(logits, axis=1, keepdims=True)
    na, n = af.shape[0], cf.shape[0]
    mask_rep = jnp.tile(mask, (ac, v))
    lm = jnp.ones((na, n), jnp.float32).at[jnp.arange(na), jnp.arange(na)].set(0.0)
    mask_rep = mask_rep * lm
    exp_logits = jnp.exp(logits) * lm
    log_prob = logits - jnp.log(exp_logits.sum(1, keepdims=True) + 1e-9)
    sum_mask = mask_rep.sum(1)
    sum_mask = jnp.where(sum_mask == 0, 1.0, sum_mask)
    if select_matrix is not None:
        sel = jnp.tile(jnp.asarray(select_matrix, jnp.float32), (ac, v))
        mlpp = (mask_rep * sel * log_prob).sum(1) / sum_mask
    else:
        mlpp = (mask_rep * log_prob).sum(1) / sum_mask
    return (-mlpp).reshape(ac, b).mean()


if __name__ == "__main__":
    key = jax.random.PRNGKey(0)
    k1, k2, k3, k4, k5, k6, k7, k8 = jax.random.split(key, 8)

    # Case 1: default identity-mask path at tiny shapes (single tile).
    B, V, D = 8, 2, 32
    feats = jax.random.normal(k1, (B, V, D), dtype=jnp.float32)
    feats = feats / jnp.linalg.norm(feats, axis=-1, keepdims=True)
    loss = jax.block_until_ready(debias_soft_con_loss(feats))
    ref = jax.block_until_ready(_reference_loss(feats))
    assert jnp.allclose(loss, ref, rtol=5e-4, atol=5e-4), (loss, ref)

    # Case 2: labels + max_probs with shapes that exercise anchor/contrast
    # tiling, column padding and the multi-step online softmax (N = V*B = 1300).
    B2, V2, D2 = 650, 2, 32
    feats2 = jax.random.normal(k2, (B2, V2, D2), dtype=jnp.float32)
    feats2 = feats2 / jnp.linalg.norm(feats2, axis=-1, keepdims=True)
    labels2 = jax.random.randint(k3, (B2,), 0, 10)
    mp2 = jax.random.uniform(k4, (B2,), minval=0.5, maxval=1.0)
    loss2 = jax.block_until_ready(
        debias_soft_con_loss(feats2, max_probs=mp2, labels=labels2))
    ref2 = jax.block_until_ready(
        _reference_loss(feats2, max_probs=mp2, labels=labels2))
    assert jnp.allclose(loss2, ref2, rtol=5e-4, atol=5e-4), (loss2, ref2)

    # Case 3: explicit dense mask + select_matrix fallback path (labels, no
    # max_probs) at small shapes.
    B3, V3, D3 = 16, 2, 32
    feats3 = jax.random.normal(k5, (B3, V3, D3), dtype=jnp.float32)
    feats3 = feats3 / jnp.linalg.norm(feats3, axis=-1, keepdims=True)
    labels3 = jax.random.randint(k6, (B3,), 0, 4)
    mask3 = (jax.random.uniform(k7, (B3, B3)) > 0.3).astype(jnp.float32)
    sel3 = (jax.random.uniform(k8, (B3, B3)) > 0.5).astype(jnp.float32)
    loss3 = jax.block_until_ready(
        debias_soft_con_loss(feats3, labels=labels3, mask=mask3,
                             select_matrix=sel3))
    ref3 = jax.block_until_ready(
        _reference_loss(feats3, labels=labels3, mask=mask3,
                        select_matrix=sel3))
    assert jnp.allclose(loss3, ref3, rtol=5e-4, atol=5e-4), (loss3, ref3)

    print("KERNEL_OK")
</pallas_src>

<mosaic_0001>
module attributes {stable_mosaic.version = 11 : i64} {
  func.func @kernel(%arg0: i32, %arg1: i32, %arg2: memref<16x32xf32, #tpu.memory_space<vmem>>, %arg3: memref<16x32xf32, #tpu.memory_space<vmem>>, %arg4: memref<1x16xi32, #tpu.memory_space<vmem>>, %arg5: memref<16x1xi32, #tpu.memory_space<vmem>>, %arg6: memref<1x16xf32, #tpu.memory_space<vmem>>, %arg7: memref<16x1xf32, #tpu.memory_space<vmem>>, %arg8: memref<1x16xf32, #tpu.memory_space<vmem>>, %arg9: memref<1x16xf32, #tpu.memory_space<vmem>>, %arg10: memref<1x16xf32, #tpu.memory_space<vmem>>, %arg11: memref<1x16xf32, #tpu.memory_space<vmem>>, %arg12: memref<1x16xf32, #tpu.memory_space<vmem>>) attributes {dimension_semantics = [#tpu.dimension_semantics<parallel>, #tpu.dimension_semantics<arbitrary>], iteration_bounds = array<i64: 1, 1>, scalar_prefetch = 0 : i64, scratch_operands = 4 : i64, tpu.core_type = #tpu.core_type<tc>, window_params = [{transform_indices = @transform_0, window_bounds = array<i64: 16, 32>}, {transform_indices = @transform_1, window_bounds = array<i64: 16, 32>}, {transform_indices = @transform_2, window_bounds = array<i64: 1, 16>}, {transform_indices = @transform_3, window_bounds = array<i64: 16, 1>}, {transform_indices = @transform_4, window_bounds = array<i64: 1, 16>}, {transform_indices = @transform_5, window_bounds = array<i64: 16, 1>}, {transform_indices = @transform_6, window_bounds = array<i64: 1, 16>}]} {
    %c0_i32 = arith.constant 0 : i32
    %0 = arith.cmpi eq, %arg1, %c0_i32 : i32
    %1 = arith.extui %0 : i1 to i32
    %c0_i32_0 = arith.constant 0 : i32
    %2 = arith.cmpi ne, %1, %c0_i32_0 : i32
    scf.if %2 {
      %cst_40 = arith.constant -1.000000e+30 : f32
      %59 = vector.broadcast %cst_40 : f32 to vector<1x16xf32>
      %c0_41 = arith.constant 0 : index
      %c0_42 = arith.constant 0 : index
      %60 = vector.load %arg9[%c0_41, %c0_42] : memref<1x16xf32, #tpu.memory_space<vmem>>, vector<1x16xf32>
      tpu.vector_store %arg9[%c0_41, %c0_42], %59 {strides = array<i32>} : memref<1x16xf32, #tpu.memory_space<vmem>>, vector<1x16xf32>,
      %cst_43 = arith.constant 0.000000e+00 : f32
      %61 = vector.broadcast %cst_43 : f32 to vector<1x16xf32>
      %c0_44 = arith.constant 0 : index
      %c0_45 = arith.constant 0 : index
      %62 = vector.load %arg10[%c0_44, %c0_45] : memref<1x16xf32, #tpu.memory_space<vmem>>, vector<1x16xf32>
      tpu.vector_store %arg10[%c0_44, %c0_45], %61 {strides = array<i32>} : memref<1x16xf32, #tpu.memory_space<vmem>>, vector<1x16xf32>,
      %cst_46 = arith.constant 0.000000e+00 : f32
      %63 = vector.broadcast %cst_46 : f32 to vector<1x16xf32>
      %c0_47 = arith.constant 0 : index
      %c0_48 = arith.constant 0 : index
      %64 = vector.load %arg11[%c0_47, %c0_48] : memref<1x16xf32, #tpu.memory_space<vmem>>, vector<1x16xf32>
      tpu.vector_store %arg11[%c0_47, %c0_48], %63 {strides = array<i32>} : memref<1x16xf32, #tpu.memory_space<vmem>>, vector<1x16xf32>,
      %cst_49 = arith.constant 0.000000e+00 : f32
      %65 = vector.broadcast %cst_49 : f32 to vector<1x16xf32>
      %c0_50 = arith.constant 0 : index
      %c0_51 = arith.constant 0 : index
      %66 = vector.load %arg12[%c0_50, %c0_51] : memref<1x16xf32, #tpu.memory_space<vmem>>, vector<1x16xf32>
      tpu.vector_store %arg12[%c0_50, %c0_51], %65 {strides = array<i32>} : memref<1x16xf32, #tpu.memory_space<vmem>>, vector<1x16xf32>,
    } else {
    }
    %c0 = arith.constant 0 : index
    %c0_1 = arith.constant 0 : index
    %3 = vector.load %arg2[%c0, %c0_1] : memref<16x32xf32, #tpu.memory_space<vmem>>, vector<16x32xf32>
    %cst = arith.constant 14.2857141 : f32
    %4 = vector.broadcast %cst : f32 to vector<16x32xf32>
    %5 = arith.mulf %3, %4 : vector<16x32xf32>
    %c0_2 = arith.constant 0 : index
    %c0_3 = arith.constant 0 : index
    %6 = vector.load %arg3[%c0_2, %c0_3] : memref<16x32xf32, #tpu.memory_space<vmem>>, vector<16x32xf32>
    %cst_4 = arith.constant dense<0.000000e+00> : vector<16x16xf32>
    %7 = tpu.matmul %6, %5, %cst_4 {dimension_numbers = #tpu.dot_dimension_numbers<[1], [1], [0], [0], [0, 0, 1, 0], [], []>} : vector<16x32xf32>, vector<16x32xf32>, vector<16x16xf32> -> vector<16x16xf32>
    %c0_5 = arith.constant 0 : index
    %c0_6 = arith.constant 0 : index
    %8 = vector.load %arg9[%c0_5, %c0_6] : memref<1x16xf32, #tpu.memory_space<vmem>>, vector<1x16xf32>
    %cst_7 = arith.constant dense<0xFF800000> : vector<16xf32>
    %9 = vector.multi_reduction <maximumf>, %7, %cst_7 [0] : vector<16x16xf32> to vector<16xf32>
    %10 = vector.shape_cast %9 : vector<16xf32> to vector<1x16xf32>
    %11 = arith.maximumf %8, %10 : vector<1x16xf32>
    %12 = arith.subf %8, %11 : vector<1x16xf32>
    %13 = math.exp %12 : vector<1x16xf32>
    %c0_8 = arith.constant 0 : index
    %c0_9 = arith.constant 0 : index
    %14 = vector.load %arg10[%c0_8, %c0_9] : memref<1x16xf32, #tpu.memory_space<vmem>>, vector<1x16xf32>
    %15 = arith.mulf %13, %14 : vector<1x16xf32>
    %16 = vector.broadcast %11 : vector<1x16xf32> to vector<16x16xf32>
    %17 = arith.subf %7, %16 : vector<16x16xf32>
    %18 = math.exp %17 : vector<16x16xf32>
    %c0_10 = arith.constant 0 : index
    %c0_11 = arith.constant 0 : index
    %19 = vector.load %arg5[%c0_10, %c0_11] : memref<16x1xi32, #tpu.memory_space<vmem>>, vector<16x1xi32>
    %c0_12 = arith.constant 0 : index
    %c0_13 = arith.constant 0 : index
    %20 = vector.load %arg4[%c0_12, %c0_13] : memref<1x16xi32, #tpu.memory_space<vmem>>, vector<1x16xi32>
    %21 = vector.broadcast %19 : vector<16x1xi32> to vector<16x16xi32>
    %22 = vector.broadcast %20 : vector<1x16xi32> to vector<16x16xi32>
    %23 = arith.cmpi eq, %21, %22 : vector<16x16xi32>
    %c0_14 = arith.constant 0 : index
    %c0_15 = arith.constant 0 : index
    %24 = vector.load %arg7[%c0_14, %c0_15] : memref<16x1xf32, #tpu.memory_space<vmem>>, vector<16x1xf32>
    %c0_16 = arith.constant 0 : index
    %c0_17 = arith.constant 0 : index
    %25 = vector.load %arg6[%c0_16, %c0_17] : memref<1x16xf32, #tpu.memory_space<vmem>>, vector<1x16xf32>
    %26 = vector.broadcast %24 : vector<16x1xf32> to vector<16x16xf32>
    %27 = vector.broadcast %25 : vector<1x16xf32> to vector<16x16xf32>
    %28 = arith.mulf %26, %27 : vector<16x16xf32>
    %cst_18 = arith.constant 0.000000e+00 : f32
    %29 = vector.broadcast %cst_18 : f32 to vector<16x16xf32>
    %30 = arith.select %23, %28, %29 : vector<16x16xi1>, vector<16x16xf32>
    %31 = arith.mulf %30, %7 : vector<16x16xf32>
    %c0_19 = arith.constant 0 : index
    %c0_20 = arith.constant 0 : index
    %32 = vector.load %arg9[%c0_19, %c0_20] : memref<1x16xf32, #tpu.memory_space<vmem>>, vector<1x16xf32>
    tpu.vector_store %arg9[%c0_19, %c0_20], %11 {strides = array<i32>} : memref<1x16xf32, #tpu.memory_space<vmem>>, vector<1x16xf32>,
    %cst_21 = arith.constant dense<0.000000e+00> : vector<16xf32>
    %33 = vector.multi_reduction <add>, %18, %cst_21 [0] : vector<16x16xf32> to vector<16xf32>
    %34 = vector.shape_cast %33 : vector<16xf32> to vector<1x16xf32>
    %35 = arith.addf %15, %34 : vector<1x16xf32>
    %c0_22 = arith.constant 0 : index
    %c0_23 = arith.constant 0 : index
    %36 = vector.load %arg10[%c0_22, %c0_23] : memref<1x16xf32, #tpu.memory_space<vmem>>, vector<1x16xf32>
    tpu.vector_store %arg10[%c0_22, %c0_23], %35 {strides = array<i32>} : memref<1x16xf32, #tpu.memory_space<vmem>>, vector<1x16xf32>,
    %c0_24 = arith.constant 0 : index
    %c0_25 = arith.constant 0 : index
    %37 = vector.load %arg12[%c0_24, %c0_25] : memref<1x16xf32, #tpu.memory_space<vmem>>, vector<1x16xf32>
    %cst_26 = arith.constant dense<0.000000e+00> : vector<16xf32>
    %38 = vector.multi_reduction <add>, %30, %cst_26 [0] : vector<16x16xf32> to vector<16xf32>
    %39 = vector.shape_cast %38 : vector<16xf32> to vector<1x16xf32>
    %40 = arith.addf %37, %39 : vector<1x16xf32>
    %c0_27 = arith.constant 0 : index
    %c0_28 = arith.constant 0 : index
    %41 = vector.load %arg12[%c0_27, %c0_28] : memref<1x16xf32, #tpu.memory_space<vmem>>, vector<1x16xf32>
    tpu.vector_store %arg12[%c0_27, %c0_28], %40 {strides = array<i32>} : memref<1x16xf32, #tpu.memory_space<vmem>>, vector<1x16xf32>,
    %c0_29 = arith.constant 0 : index
    %c0_30 = arith.constant 0 : index
    %42 = vector.load %arg11[%c0_29, %c0_30] : memref<1x16xf32, #tpu.memory_space<vmem>>, vector<1x16xf32>
    %cst_31 = arith.constant dense<0.000000e+00> : vector<16xf32>
    %43 = vector.multi_reduction <add>, %31, %cst_31 [0] : vector<16x16xf32> to vector<16xf32>
    %44 = vector.shape_cast %43 : vector<16xf32> to vector<1x16xf32>
    %45 = arith.addf %42, %44 : vector<1x16xf32>
    %c0_32 = arith.constant 0 : index
    %c0_33 = arith.constant 0 : index
    %46 = vector.load %arg11[%c0_32, %c0_33] : memref<1x16xf32, #tpu.memory_space<vmem>>, vector<1x16xf32>
    tpu.vector_store %arg11[%c0_32, %c0_33], %45 {strides = array<i32>} : memref<1x16xf32, #tpu.memory_space<vmem>>, vector<1x16xf32>,
    %c16_i32 = arith.constant 16 : i32
    %47 = arith.muli %arg0, %c16_i32 : i32
    %c16_i32_34 = arith.constant 16 : i32
    %48 = arith.muli %arg1, %c16_i32_34 : i32
    %c16_i32_35 = arith.constant 16 : i32
    %49 = arith.addi %48, %c16_i32_35 : i32
    %50 = arith.cmpi slt, %47, %49 : i32
    %c16_i32_36 = arith.constant 16 : i32
    %51 = arith.addi %47, %c16_i32_36 : i32
    %52 = arith.cmpi slt, %48, %51 : i32
    %53 = arith.andi %50, %52 : i1
    %54 = arith.extui %53 : i1 to i32
    %c0_i32_37 = arith.constant 0 : i32
    %55 = arith.cmpi ne, %54, %c0_i32_37 : i32
    scf.if %55 {
      %59 = tpu.iota {dimensions = array<i32: 1>} : vector<16x16xi32>
      %60 = vector.broadcast %47 : i32 to vector<16x16xi32>
      %61 = arith.addi %60, %59 : vector<16x16xi32>
      %62 = tpu.iota {dimensions = array<i32: 0>} : vector<16x16xi32>
      %63 = vector.broadcast %48 : i32 to vector<16x16xi32>
      %64 = arith.addi %63, %62 : vector<16x16xi32>
      %65 = arith.cmpi eq, %61, %64 : vector<16x16xi32>
      %cst_40 = arith.constant 0.000000e+00 : f32
      %66 = vector.broadcast %cst_40 : f32 to vector<16x16xf32>
      %67 = arith.select %65, %66, %18 : vector<16x16xi1>, vector<16x16xf32>
      %cst_41 = arith.constant dense<0.000000e+00> : vector<16xf32>
      %68 = vector.multi_reduction <add>, %67, %cst_41 [0] : vector<16x16xf32> to vector<16xf32>
      %69 = vector.shape_cast %68 : vector<16xf32> to vector<1x16xf32>
      %70 = arith.addf %15, %69 : vector<1x16xf32>
      %c0_42 = arith.constant 0 : index
      %c0_43 = arith.constant 0 : index
      %71 = vector.load %arg10[%c0_42, %c0_43] : memref<1x16xf32, #tpu.memory_space<vmem>>, vector<1x16xf32>
      tpu.vector_store %arg10[%c0_42, %c0_43], %70 {strides = array<i32>} : memref<1x16xf32, #tpu.memory_space<vmem>>, vector<1x16xf32>,
      %c0_44 = arith.constant 0 : index
      %c0_45 = arith.constant 0 : index
      %72 = vector.load %arg12[%c0_44, %c0_45] : memref<1x16xf32, #tpu.memory_space<vmem>>, vector<1x16xf32>
      %cst_46 = arith.constant 0.000000e+00 : f32
      %73 = vector.broadcast %cst_46 : f32 to vector<16x16xf32>
      %74 = arith.select %65, %30, %73 : vector<16x16xi1>, vector<16x16xf32>
      %cst_47 = arith.constant dense<0.000000e+00> : vector<16xf32>
      %75 = vector.multi_reduction <add>, %74, %cst_47 [0] : vector<16x16xf32> to vector<16xf32>
      %76 = vector.shape_cast %75 : vector<16xf32> to vector<1x16xf32>
      %77 = arith.subf %72, %76 : vector<1x16xf32>
      %c0_48 = arith.constant 0 : index
      %c0_49 = arith.constant 0 : index
      %78 = vector.load %arg12[%c0_48, %c0_49] : memref<1x16xf32, #tpu.memory_space<vmem>>, vector<1x16xf32>
      tpu.vector_store %arg12[%c0_48, %c0_49], %77 {strides = array<i32>} : memref<1x16xf32, #tpu.memory_space<vmem>>, vector<1x16xf32>,
      %c0_50 = arith.constant 0 : index
      %c0_51 = arith.constant 0 : index
      %79 = vector.load %arg11[%c0_50, %c0_51] : memref<1x16xf32, #tpu.memory_space<vmem>>, vector<1x16xf32>
      %cst_52 = arith.constant 0.000000e+00 : f32
      %80 = vector.broadcast %cst_52 : f32 to vector<16x16xf32>
      %81 = arith.select %65, %31, %80 : vector<16x16xi1>, vector<16x16xf32>
      %cst_53 = arith.constant dense<0.000000e+00> : vector<16xf32>
      %82 = vector.multi_reduction <add>, %81, %cst_53 [0] : vector<16x16xf32> to vector<16xf32>
      %83 = vector.shape_cast %82 : vector<16xf32> to vector<1x16xf32>
      %84 = arith.subf %79, %83 : vector<1x16xf32>
      %c0_54 = arith.constant 0 : index
      %c0_55 = arith.constant 0 : index
      %85 = vector.load %arg11[%c0_54, %c0_55] : memref<1x16xf32, #tpu.memory_space<vmem>>, vector<1x16xf32>
      tpu.vector_store %arg11[%c0_54, %c0_55], %84 {strides = array<i32>} : memref<1x16xf32, #tpu.memory_space<vmem>>, vector<1x16xf32>,
    } else {
    }
    %c0_i32_38 = arith.constant 0 : i32
    %56 = arith.cmpi eq, %arg1, %c0_i32_38 : i32
    %57 = arith.extui %56 : i1 to i32
    %c0_i32_39 = arith.constant 0 : i32
    %58 = arith.cmpi ne, %57, %c0_i32_39 : i32
    scf.if %58 {
      %c0_40 = arith.constant 0 : index
      %c0_41 = arith.constant 0 : index
      %59 = vector.load %arg10[%c0_40, %c0_41] : memref<1x16xf32, #tpu.memory_space<vmem>>, vector<1x16xf32>
      %c0_42 = arith.constant 0 : index
      %c0_43 = arith.constant 0 : index
      %60 = vector.load %arg9[%c0_42, %c0_43] : memref<1x16xf32, #tpu.memory_space<vmem>>, vector<1x16xf32>
      %cst_44 = arith.constant 9.99999971E-10 : f32
      %61 = vector.broadcast %cst_44 : f32 to vector<1x16xf32>
      %62 = arith.addf %59, %61 : vector<1x16xf32>
      %63 = math.log %62 : vector<1x16xf32>
      %64 = arith.addf %60, %63 : vector<1x16xf32>
      %c0_45 = arith.constant 0 : index
      %c0_46 = arith.constant 0 : index
      %65 = vector.load %arg12[%c0_45, %c0_46] : memref<1x16xf32, #tpu.memory_space<vmem>>, vector<1x16xf32>
      %cst_47 = arith.constant 0.000000e+00 : f32
      %66 = vector.broadcast %cst_47 : f32 to vector<1x16xf32>
      %67 = arith.cmpf oeq, %65, %66 : vector<1x16xf32>
      %cst_48 = arith.constant 1.000000e+00 : f32
      %68 = vector.broadcast %cst_48 : f32 to vector<1x16xf32>
      %69 = arith.select %67, %68, %65 : vector<1x16xi1>, vector<1x16xf32>
      %c0_49 = arith.constant 0 : index
      %c0_50 = arith.constant 0 : index
      %70 = vector.load %arg11[%c0_49, %c0_50] : memref<1x16xf32, #tpu.memory_space<vmem>>, vector<1x16xf32>
      %71 = arith.mulf %64, %65 : vector<1x16xf32>
      %72 = arith.subf %70, %71 : vector<1x16xf32>
      %73 = tpu.reciprocal %69 : vector<1x16xf32> -> vector<1x16xf32>
      %74 = arith.mulf %72, %73 : vector<1x16xf32>
      %cst_51 = arith.constant 0.000000e+00 : f32
      %75 = vector.broadcast %cst_51 : f32 to vector<1x16xf32>
      %76 = arith.subf %75, %74 : vector<1x16xf32>
      %c0_52 = arith.constant 0 : index
      %c0_53 = arith.constant 0 : index
      %77 = vector.load %arg8[%c0_52, %c0_53] : memref<1x16xf32, #tpu.memory_space<vmem>>, vector<1x16xf32>
      tpu.vector_store %arg8[%c0_52, %c0_53], %76 {strides = array<i32>} : memref<1x16xf32, #tpu.memory_space<vmem>>, vector<1x16xf32>,
    } else {
    }
    return
  }
  func.func @transform_0(%arg0: i32, %arg1: i32) -> (i32, i32) {
    %c0_i32 = arith.constant 0 : i32
    %c0_i32_0 = arith.constant 0 : i32
    return %arg0, %c0_i32 : i32, i32
  }
  func.func @transform_1(%arg0: i32, %arg1: i32) -> (i32, i32) {
    %c0_i32 = arith.constant 0 : i32
    %c0_i32_0 = arith.constant 0 : i32
    return %arg1, %c0_i32 : i32, i32
  }
  func.func @transform_2(%arg0: i32, %arg1: i32) -> (i32, i32) {
    %c0_i32 = arith.constant 0 : i32
    %c0_i32_0 = arith.constant 0 : i32
    return %c0_i32, %arg0 : i32, i32
  }
  func.func @transform_3(%arg0: i32, %arg1: i32) -> (i32, i32) {
    %c0_i32 = arith.constant 0 : i32
    %c0_i32_0 = arith.constant 0 : i32
    return %arg1, %c0_i32 : i32, i32
  }
  func.func @transform_4(%arg0: i32, %arg1: i32) -> (i32, i32) {
    %c0_i32 = arith.constant 0 : i32
    %c0_i32_0 = arith.constant 0 : i32
    return %c0_i32, %arg0 : i32, i32
  }
  func.func @transform_5(%arg0: i32, %arg1: i32) -> (i32, i32) {
    %c0_i32 = arith.constant 0 : i32
    %c0_i32_0 = arith.constant 0 : i32
    return %arg1, %c0_i32 : i32, i32
  }
  func.func @transform_6(%arg0: i32, %arg1: i32) -> (i32, i32) {
    %c0_i32 = arith.constant 0 : i32
    %c0_i32_0 = arith.constant 0 : i32
    return %c0_i32, %arg0 : i32, i32
  }
}

</mosaic_0001>

<bundles_post_ra>
// kernel: tpu_custom_call.1
= control target key start
LH: loop header
LB: loop body
LE: loop exit
PB: predicated region body
PF: predicated region fallthrough
CT: control target
= control target key end

     0   :  { %vm39_vm0 = vcmask 261120   ;;  %v392_v5 = vmov 0   ;;  %s533_s0 = inlined_call_operand.vmem [shape: f32[16,32], index: 0, kind: input, shape index: {}]   ;;  %s534_s1 = inlined_call_operand.vmem [shape: f32[16,32], index: 1, kind: input, shape index: {}]   ;;  %s535_s2 = inlined_call_operand.vmem [shape: s32[1,16], index: 2, kind: input, shape index: {}]   ;;  %s536_s3 = inlined_call_operand.vmem [shape: s32[16,1], index: 3, kind: input, shape index: {}]   ;;  %s537_s4 = inlined_call_operand.vmem [shape: f32[1,16], index: 4, kind: input, shape index: {}]   ;;  %s538_s5 = inlined_call_operand.vmem [shape: f32[16,1], index: 5, kind: input, shape index: {}]   ;;  %s539_s6 = inlined_call_operand.hbm [shape: f32[1,16], index: 6, kind: output, shape index: {}]  }
   0x1   :  { %v33_v0 = vld [vmem:[%s533_s0] sm:$0xff]  ;;  %v34_v1 = vld [vmem:[%s533_s0 + $0x8] sm:$0xff]  ;;  %356 = vset.pattern.permute.xlu0 %v392_v5  ;;  %vm347_vm1 = vmpackc.low %vm39_vm0, %vm39_vm0  ;;  %357 = vset.pattern.permute.xlu1 %v392_v5 }
   0x2   :  { %v37_v2 = vld [vmem:[%s534_s1] sm:$0xff]  ;;  %v35_v3 = vmul.f32 14.285714, %v33_v0  ;;  %v36_v4 = vmul.f32 14.285714, %v34_v1  ;;  %v172_v9 = vld [vmem:[%s538_s5 + $0x8] sm:$0xff] }
   0x3   :  { %343 = vmatprep.mubr.msk.f32.mxu0 %vm39_vm0, %v37_v2  ;;  %v171_v6 = vld [vmem:[%s538_s5] sm:$0xff] }
   0x4   :  { %176 = vperm.xlu0 %356, %v171_v6   ;;  %v156_v7 = vld [vmem:[%s536_s3] sm:$0xff]  ;;  %v346_v8 = vpack.c.bf16 %v36_v4, %v35_v3 }
   0x5   :  { %160 = vperm.xlu1 %357, %v156_v7  }
   0x6   :  { %11 = vsyncpa [#allocation7], 0  ;;  %v157_v10 = vld [vmem:[%s536_s3 + $0x8] sm:$0xff]  ;;  %348 = vmatprep.subr.msk.bf16.mxu0 %vm347_vm1, %v346_v8  ;;  %vm28_vm2 = vcmask 122880   ;;  %v393_v11 = vmov 0.0   ;;  %v145_v14 = vlaneseq  ;;  %vm128_vm5 = vcmask 130048  }
   0x7   :  { %351 = vmatpush3.bf16.xpose.msk.msra.mxu0 %vm347_vm1, %v346_v8  ;;  %30 = vst.msk [vmem:[#allocation3] sm:$0x1] %vm28_vm2, %v393_v11  ;;  %32 = vst.msk [vmem:[#allocation5] sm:$0x1] %vm28_vm2, %v393_v11  ;;  %v38_v12 = vld [vmem:[%s534_s1 + $0x8] sm:$0xff]  ;;  %s395_s1 = smov [#allocation6]  }
   0x8   :  { %181 = vperm.xlu0 %356, %v172_v9   ;;  %31 = vst.msk [vmem:[#allocation4] sm:$0x1] %vm28_vm2, %v393_v11  ;;  %v394_v13 = vmov -1e+30   ;;  %v334_v15 = vld [vmem:[%s537_s4] ss:$0 sm:$0xff] }
   0x9   :  { %163 = vperm.xlu1 %357, %v157_v10   ;;  %29 = vst.msk [vmem:[#allocation2] sm:$0x1] %vm28_vm2, %v394_v13  ;;  %v333_v16 = vld [vmem:[%s535_s2] ss:$0 sm:$0xff]  ;;  %v469_v17 = vshrl.u32 %v145_v14, 7  ;;  %v471_v18 = vand.u32 127, %v145_v14 }
   0xa   :  { %s321_s2 = sshll.u32 %s395_s1, 4  ;;  %s322_s2 = int_to_ptr.vmem [resolvable:$true] %s321_s2 }
   0xb   :  { %vm253_vm4 = vcmp.eq.s32.totalorder %v471_v18, %v469_v17  ;;  %v476_v23 = vadd.s32 8, %v469_v17  ;;  %s368_s4 = scalar_lea.vmem %s322_s2, 16  ;;  %s372_s14 = scalar_lea.vmem %s322_s2, 32 }
   0xc   :  { %p369_p0 = scmp.ne.s32.totalorder %s322_s2, %s368_s4  ;;  %p373_p1 = scmp.lt.s32.totalorder %s322_s2, %s322_s2 }
   0xd   :  { %vm254_vm7 = vcmp.eq.s32.totalorder %v471_v18, %v476_v23  ;;  %p374_p2 = scmp.lt.s32.totalorder %s372_s14, %s368_s4 }
   0xe   :  { %344 = vmatmul.mubr.msk.f32.vlgmr.msra.gmra.mrb[0].mxu0 %vm39_vm0, %v38_v12  ;;  %v209_v44 = vld [vmem:[#allocation5] sm:$0x1] }
   0xf   :  { %p375_p3 = por %p374_p2, %p373_p1 }
  0x10   :  { %v127_v14 = vld [vmem:[#allocation2] sm:$0x1] }
  0x11   :  { %p376_p4 = pnand %p375_p3, %p369_p0 }
  0x83   :  { %v177_v19 = vpop.permute.xlu0 %176 }
  0x84   :  { %v190_v20 = vmul.f32 %v334_v15, %v177_v19  ;;  %v161_v21 = vpop.permute.xlu1 %160 }
  0x85   :  { %vm169_vm3 = vcmp.eq.s32.totalorder %v161_v21, %v333_v16  ;;  %v221_v21 = vld [vmem:[#allocation4] sm:$0x1] }
  0x86   :  { %v192_v22 = vsel %vm169_vm3, %v190_v20, 0.0 }
  0x87   :  { %v269_v24 = vsel %vm253_vm4, %v192_v22, 0.0  ;;  %v182_v25 = vpop.permute.xlu0 %181  ;;  %v210_v28 = vsel %vm128_vm5, %v192_v22, 0.0 }
  0x88   :  { %v191_v26 = vmul.f32 %v334_v15, %v182_v25  ;;  %v164_v27 = vpop.permute.xlu1 %163  ;;  %v271_v29 = vsel %vm128_vm5, %v269_v24, 0.0 }
  0x89   :  { %vm170_vm6 = vcmp.eq.s32.totalorder %v164_v27, %v333_v16  ;;  %v147_v16 = vsub.s32 0, %v469_v17 }
  0x8a   :  { %v193_v30 = vsel %vm170_vm6, %v191_v26, 0.0 }
  0x8b   :  { %v211_v31 = vsel %vm128_vm5, %v193_v30, 0.0  ;;  %v270_v32 = vsel %vm254_vm7, %v193_v30, 0.0 }
  0x8c   :  { %v212_v33 = vadd.f32 %v211_v31, %v210_v28  ;;  %v272_v34 = vsel %vm128_vm5, %v270_v32, 0.0 }
  0x8d   :  { %v273_v35 = vadd.f32 %v272_v34, %v271_v29 }
  0x8e   :  { %v213_v36 = vrot.slane %v212_v33, 4 }
  0x8f   :  { %v274_v37 = vrot.slane %v273_v35, 4 }
  0x90   :  { %v214_v38 = vadd.f32 %v213_v36, %v212_v33 }
  0x91   :  { %v275_v39 = vadd.f32 %v274_v37, %v273_v35 }
  0x92   :  { %v215_v40 = vrot.slane %v214_v38, 2 }
  0x93   :  { %v276_v42 = vrot.slane %v275_v39, 2 }
  0x94   :  { %v216_v41 = vadd.f32 %v215_v40, %v214_v38 }
  0x95   :  { %v277_v46 = vadd.f32 %v276_v42, %v275_v39 }
  0x96   :  { %v217_v43 = vrot.slane %v216_v41, 1 }
  0x97   :  { %v278_v48 = vrot.slane %v277_v46, 1 }
  0x98   :  { %v218_v45 = vadd.f32 %v217_v43, %v216_v41 }
  0x99   :  { %v279_v49 = vadd.f32 %v278_v48, %v277_v46 }
  0x9a   :  { %v219_v47 = vadd.f32 %v218_v45, %v209_v44 }
  0x9c   :  { %220 = vst.msk [vmem:[#allocation5] sm:$0x1] %vm28_vm2, %v219_v47 }
  0xa3   :  { %v268_v50 = vld [vmem:[#allocation5] sm:$0x1] }
  0xa4   :  { %v280_v51 = vsub.f32 %v268_v50, %v279_v49 }
  0xa6   :  { %281 = vst.msk [vmem:[#allocation5] sm:$0x1] %vm28_vm2, %v280_v51 }
  0xe1   :  { %v345_v52 = vpop.f32.mrb[0].mxu0 }
  0xe2   :  { %v130_v53 = vsel %vm128_vm5, %v345_v52, -inf  ;;  %v195_v54 = vmul.f32 %v345_v52, %v193_v30  ;;  %v118_v55 = vpop.f32.mrb[1].mxu0 }
  0xe3   :  { %v129_v56 = vsel %vm128_vm5, %v118_v55, -inf  ;;  %v194_v57 = vmul.f32 %v192_v22, %v118_v55 }
  0xe4   :  { %v223_v58 = vsel %vm128_vm5, %v195_v54, 0.0  ;;  %v284_v59 = vsel %vm254_vm7, %v195_v54, 0.0  ;;  %v131_v60 = vmax.f32 %v129_v56, %v130_v53 }
  0xe5   :  { %v286_v61 = vsel %vm128_vm5, %v284_v59, 0.0  ;;  %v222_v62 = vsel %vm128_vm5, %v194_v57, 0.0  ;;  %v283_v63 = vsel %vm253_vm4, %v194_v57, 0.0 }
  0xe6   :  { %v132_v0 = vrot.slane %v131_v60, 4  ;;  %v224_v1 = vadd.f32 %v223_v58, %v222_v62  ;;  %v285_v2 = vsel %vm128_vm5, %v283_v63, 0.0 }
  0xe7   :  { %v287_v3 = vadd.f32 %v286_v61, %v285_v2 }
  0xe8   :  { %v133_v4 = vmax.f32 %v131_v60, %v132_v0  ;;  %v225_v5 = vrot.slane %v224_v1, 4  ;;  %v305_v0 = vld [vmem:[#allocation5] sm:$0x1] }
  0xe9   :  { %v288_v6 = vrot.slane %v287_v3, 4  ;;  %vm306_vm8 = vcmp.eq.f32.partialorder %v305_v0, 0.0 }
  0xea   :  { %v134_v7 = vrot.slane %v133_v4, 2  ;;  %v226_v8 = vadd.f32 %v225_v5, %v224_v1  ;;  %v307_v1 = vsel %vm306_vm8, 1.0, %v305_v0 }
  0xeb   :  { %v289_v11 = vadd.f32 %v288_v6, %v287_v3 }
  0xec   :  { %v135_v9 = vmax.f32 %v133_v4, %v134_v7  ;;  %v227_v10 = vrot.slane %v226_v8, 2 }
  0xed   :  { %v290_v20 = vrot.slane %v289_v11, 2 }
  0xee   :  { %v136_v12 = vrot.slane %v135_v9, 1  ;;  %v228_v13 = vadd.f32 %v227_v10, %v226_v8 }
  0xef   :  { %v291_v27 = vadd.f32 %v290_v20, %v289_v11 }
  0xf0   :  { %v137_v15 = vmax.f32 %v135_v9, %v136_v12  ;;  %v229_v19 = vrot.slane %v228_v13, 1 }
  0xf1   :  { %v292_v32 = vrot.slane %v291_v27, 1 }
  0xf2   :  { %v138_v22 = vmax.f32 %v127_v14, %v137_v15  ;;  %v230_v24 = vadd.f32 %v229_v19, %v228_v13 }
  0xf3   :  { %v293_v33 = vadd.f32 %v292_v32, %v291_v27 }
  0xf4   :  { %v148_v25 = vrot.slane %v138_v22, %v147_v16  ;;  %197 = vst.msk [vmem:[#allocation2] sm:$0x1] %vm28_vm2, %v138_v22  ;;  %v231_v26 = vadd.f32 %v230_v24, %v221_v21  ;;  %v139_v35 = vsub.f32 %v127_v14, %v138_v22 }
  0xf6   :  { %v150_v28 = vsub.f32 %v118_v55, %v148_v25  ;;  %v151_v29 = vsub.f32 %v345_v52, %v148_v25  ;;  %232 = vst.msk [vmem:[#allocation4] sm:$0x1] %vm28_vm2, %v231_v26  ;;  %v140_v37 = vmul.f32 1.442695, %v139_v35  ;;  %v142_v55 = vld [vmem:[#allocation3] sm:$0x1] }
  0xf8   :  { %v152_v30 = vmul.f32 1.442695, %v150_v28  ;;  %v154_v31 = vmul.f32 1.442695, %v151_v29 }
  0xfa   :  { %358 = vpow2.f32 %v152_v30 }
  0xfb   :  { %360 = vpow2.f32 %v154_v31  ;;  %v300_v4 = vld [vmem:[#allocation2] sm:$0x1] }
  0xfc   :  { %362 = vpow2.f32 %v140_v37 }
  0xfd   :  { %v282_v34 = vld [vmem:[#allocation4] sm:$0x1] }
  0xfe   :  { %v294_v36 = vsub.f32 %v282_v34, %v293_v33 }
 0x100   :  { %295 = vst.msk [vmem:[#allocation4] sm:$0x1] %vm28_vm2, %v294_v36 }
 0x104   :  { %v359_v38 = vpop.eup %358 }
 0x105   :  { %v361_v39 = vpop.eup %360  ;;  %v198_v40 = vsel %vm128_vm5, %v359_v38, 0.0  ;;  %v255_v41 = vsel %vm253_vm4, 0.0, %v359_v38 }
 0x106   :  { %v199_v42 = vsel %vm128_vm5, %v361_v39, 0.0  ;;  %v256_v43 = vsel %vm254_vm7, 0.0, %v361_v39  ;;  %v257_v44 = vsel %vm128_vm5, %v255_v41, 0.0  ;;  %v363_v54 = vpop.eup %362 }
 0x107   :  { %v200_v45 = vadd.f32 %v199_v42, %v198_v40  ;;  %v258_v46 = vsel %vm128_vm5, %v256_v43, 0.0  ;;  %v143_v18 = vmul.f32 %v363_v54, %v142_v55  ;;  %v308_v7 = vld [vmem:[#allocation4] sm:$0x1] }
 0x108   :  { %v259_v47 = vadd.f32 %v258_v46, %v257_v44 }
 0x109   :  { %v201_v48 = vrot.slane %v200_v45, 4 }
 0x10a   :  { %v260_v49 = vrot.slane %v259_v47, 4 }
 0x10b   :  { %v202_v50 = vadd.f32 %v201_v48, %v200_v45 }
 0x10c   :  { %v261_v51 = vadd.f32 %v260_v49, %v259_v47 }
 0x10d   :  { %v203_v52 = vrot.slane %v202_v50, 2 }
 0x10e   :  { %v262_v17 = vrot.slane %v261_v51, 2 }
 0x10f   :  { %v204_v53 = vadd.f32 %v203_v52, %v202_v50 }
 0x110   :  { %v263_v56 = vadd.f32 %v262_v17, %v261_v51 }
 0x111   :  { %v205_v57 = vrot.slane %v204_v53, 1 }
 0x112   :  { %v264_v58 = vrot.slane %v263_v56, 1 }
 0x113   :  { %v206_v23 = vadd.f32 %v205_v57, %v204_v53 }
 0x114   :  { %v265_v59 = vadd.f32 %v264_v58, %v263_v56 }
 0x115   :  { %v207_v60 = vadd.f32 %v206_v23, %v143_v18 }
 0x116   :  { %v266_v61 = vadd.f32 %v265_v59, %v143_v18 }
 0x117   :  { %208 = vst.msk [vmem:[#allocation3] sm:$0x1] %vm28_vm2, %v207_v60 }
 0x118   :  { %267 = vst.msk [vmem:[#allocation3] sm:$0x1] %vm28_vm2, %v266_v61 }
 0x11f   :  { %v299_v62 = vld [vmem:[#allocation3] sm:$0x1] }
 0x120   :  { %v301_v63 = vadd.f32 1e-09, %v299_v62 }
 0x122   :  { %364 = vlog2.f32 %v301_v63 }
 0x123   :  { %366 = vrcp.f32 %v307_v1 }
 0x12c   :  { %v365_v2 = vpop.eup %364 }
 0x12d   :  { %v303_v3 = vmul.f32 0.6931472, %v365_v2  ;;  %v367_v9 = vpop.eup %366 }
 0x12f   :  { %v304_v5 = vadd.f32 %v303_v3, %v300_v4 }
 0x131   :  { %v309_v6 = vmul.f32 %v305_v0, %v304_v5 }
 0x133   :  { %v310_v8 = vsub.f32 %v308_v7, %v309_v6 }
 0x135   :  { %v312_v10 = vmul.f32 %v367_v9, %v310_v8 }
 0x137   :  { %v313_v11 = vsub.f32 0.0, %v312_v10 }
 0x139   :  { %314 = vst.msk [vmem:[#allocation6] sm:$0x1] %vm28_vm2, %v313_v11 }
 0x13a   :  { %379 = shalt.err (!%p376_p4)
}
 0x13b   :  { %s380_s17 = scalar_lea.hbm %s539_s6, 16 }
 0x13c   :  { %p381_p5 = scmp.ne.s32.totalorder %s539_s6, %s380_s17  ;;  %p384_p6 = scmp.lt.u32.totalorder %s380_s17, %s539_s6 }
 0x13e   :  { %p386_p7 = pnand %p384_p6, %p381_p5 }
 0x140   :  { %389 = shalt.err (!%p386_p7)
}
 0x141   :  { %324 = dma.vmem_to_hbm [thread:$0]  %s322_s2, 16, %s539_s6, [#allocation7]  }
 0x142   :  { %390 = dma.done.wait [#allocation7], 16  }
 0x143   :  { %391 = vsyncadd [#allocation7], 4294967280 }
 0x144   :  { %328 = vsyncpa [#allocation7], 1 }

</bundles_post_ra>
